<compile_context>
chip_gen: v5e
topology: v5e:2x2
jax: 0.10.0
libtpu: 0.0.40
codegen_flags: <defaults>
</compile_context>

<pallas_src>
import jax
import jax.numpy as jnp
from jax.experimental import pallas as pl
from jax.experimental.pallas import tpu as pltpu


def _convT_kernel(x_ref, w_ref, b_ref, o_ref):
    # x_ref: (1, Cin, tl)   w_ref: (4*Cout, Cin)   b_ref: (4*Cout, 1) f32
    # o_ref: (1, 4*Cout, tl)
    acc = jnp.dot(w_ref[...], x_ref[0], preferred_element_type=jnp.float32)
    o_ref[0] = (acc + b_ref[...]).astype(o_ref.dtype)


def transition_up(x_nchw, skip_nchw, weight, bias, *, lane_tile=2048):
    """Pallas TransitionUp.

    x_nchw:    (N, Cin, H, W)
    skip_nchw: (N, Cs, 2H, 2W)
    weight:    (Cin, Cout, 2, 2)   (PyTorch ConvTranspose2d layout)
    bias:      (Cout,)
    returns:   (N, Cout + Cs, 2H, 2W)  == torch.cat([convT(x), skip], dim=1)

    lane_tile must be a multiple of 128 (default 2048).
    """
    N, Cin, H, W = x_nchw.shape
    Cout = weight.shape[1]
    HW = H * W
    C4 = 4 * Cout

    # --- zero-cost input view: NCHW is already (channel, spatial)-major per sample.
    x3 = x_nchw.reshape(N, Cin, HW)

    # Tiny weight / bias reorders (4*Cout*Cin elements; negligible).
    # Row order of wT is (a, b, oc) so the kernel output un-flattens cleanly below.
    wT = jnp.transpose(weight, (2, 3, 1, 0)).reshape(C4, Cin).astype(x_nchw.dtype)
    bias_col = jnp.tile(bias, 4).reshape(C4, 1).astype(jnp.float32)

    # Lane tile over the flattened spatial dim: full extent when small, otherwise
    # 128-aligned tiles with a masked tail (pl.cdiv grid, no divisibility assert).
    tl = HW if HW <= lane_tile else lane_tile
    n_s = pl.cdiv(HW, tl)

    itemsize = x_nchw.dtype.itemsize
    cost = pl.CostEstimate(
        flops=2 * N * HW * Cin * C4,
        transcendentals=0,
        bytes_accessed=(x3.size + wT.size + N * C4 * HW) * itemsize
        + bias_col.size * 4,
    )

    y = pl.pallas_call(
        _convT_kernel,
        out_shape=jax.ShapeDtypeStruct((N, C4, HW), x_nchw.dtype),
        grid=(N, n_s),
        in_specs=[
            pl.BlockSpec((1, Cin, tl), lambda n, s: (n, 0, s)),
            pl.BlockSpec((C4, Cin), lambda n, s: (0, 0)),   # resident (constant idx)
            pl.BlockSpec((C4, 1), lambda n, s: (0, 0)),     # resident (constant idx)
        ],
        out_specs=pl.BlockSpec((1, C4, tl), lambda n, s: (n, 0, s)),
        compiler_params=pltpu.CompilerParams(
            dimension_semantics=("parallel", "parallel")),
        cost_estimate=cost,
    )(x3, wT, bias_col)

    # --- XLA glue (fused under jit): free reshapes + one transpose of the conv
    # output, then the concat with the skip connection.
    # y[n, (a*2+b)*Cout + oc, i*W + j]  ->  out[n, oc, 2i+a, 2j+b]
    y6 = y.reshape(N, 2, 2, Cout, H, W)            # free: contiguous splits
    y6 = jnp.transpose(y6, (0, 3, 4, 1, 5, 2))     # (N, Cout, H, 2, W, 2)
    up = y6.reshape(N, Cout, 2 * H, 2 * W)         # free: contiguous merges
    return jnp.concatenate([up, skip_nchw], axis=1)


def _reference(x, skip, weight, bias):
    """Pure-JAX reference of ConvTranspose2d(k=2, s=2, p=0) + concat."""
    N, Cin, H, W = x.shape
    Cout = weight.shape[1]
    y = jnp.einsum("ncij,coab->noiajb", x, weight)
    y = y.reshape(N, Cout, 2 * H, 2 * W) + bias[None, :, None, None]
    return jnp.concatenate([y, skip], axis=1)


if __name__ == "__main__":
    key = jax.random.PRNGKey(0)
    k1, k2, k3, k4 = jax.random.split(key, 4)

    # Small shapes consistent with the module defaults (in_channels=48, out_channels=12).
    N, Cin, Cout, H, W = 2, 48, 12, 8, 8
    Cs = 16  # skip-connection channels

    x = jax.random.normal(k1, (N, Cin, H, W), dtype=jnp.float32)
    skip = jax.random.normal(k2, (N, Cs, 2 * H, 2 * W), dtype=jnp.float32)
    weight = 0.1 * jax.random.normal(k3, (Cin, Cout, 2, 2), dtype=jnp.float32)
    bias = 0.1 * jax.random.normal(k4, (Cout,), dtype=jnp.float32)

    fn = jax.jit(transition_up)
    out = jax.block_until_ready(fn(x, skip, weight, bias))
    assert out.shape == (N, Cout + Cs, 2 * H, 2 * W), out.shape

    ref = jax.block_until_ready(_reference(x, skip, weight, bias))
    err = float(jnp.max(jnp.abs(out - ref)))
    assert err < 1e-4, err

    print("KERNEL_OK")
</pallas_src>

<mosaic_0001>
module attributes {stable_mosaic.version = 11 : i64} {
  func.func @_convT_kernel(%arg0: i32, %arg1: i32, %arg2: memref<1x48x64xf32, #tpu.memory_space<vmem>>, %arg3: memref<48x48xf32, #tpu.memory_space<vmem>>, %arg4: memref<48x1xf32, #tpu.memory_space<vmem>>, %arg5: memref<1x48x64xf32, #tpu.memory_space<vmem>>) attributes {dimension_semantics = [#tpu.dimension_semantics<parallel>, #tpu.dimension_semantics<parallel>], iteration_bounds = array<i64: 2, 1>, scalar_prefetch = 0 : i64, scratch_operands = 0 : i64, tpu.core_type = #tpu.core_type<tc>, window_params = [{transform_indices = @transform_0, window_bounds = array<i64: 1, 48, 64>}, {pipeline_mode = #tpu.pipeline_mode<synchronous>, transform_indices = @transform_1, window_bounds = array<i64: 48, 48>}, {pipeline_mode = #tpu.pipeline_mode<synchronous>, transform_indices = @transform_2, window_bounds = array<i64: 48, 1>}, {transform_indices = @transform_3, window_bounds = array<i64: 1, 48, 64>}]} {
    %c0 = arith.constant 0 : index
    %c0_0 = arith.constant 0 : index
    %0 = vector.load %arg3[%c0, %c0_0] : memref<48x48xf32, #tpu.memory_space<vmem>>, vector<48x48xf32>
    %c0_1 = arith.constant 0 : index
    %c0_2 = arith.constant 0 : index
    %c0_3 = arith.constant 0 : index
    %1 = vector.load %arg2[%c0_1, %c0_2, %c0_3] : memref<1x48x64xf32, #tpu.memory_space<vmem>>, vector<1x48x64xf32>
    %2 = vector.shape_cast %1 : vector<1x48x64xf32> to vector<48x64xf32>
    %cst = arith.constant dense<0.000000e+00> : vector<48x64xf32>
    %3 = tpu.matmul %0, %2, %cst {dimension_numbers = #tpu.dot_dimension_numbers<[1], [0], [0], [1], [0, 0, 1, 1], [], []>} : vector<48x48xf32>, vector<48x64xf32>, vector<48x64xf32> -> vector<48x64xf32>
    %c0_4 = arith.constant 0 : index
    %c0_5 = arith.constant 0 : index
    %4 = vector.load %arg4[%c0_4, %c0_5] : memref<48x1xf32, #tpu.memory_space<vmem>>, vector<48x1xf32>
    %5 = vector.broadcast %4 : vector<48x1xf32> to vector<48x64xf32>
    %6 = arith.addf %3, %5 : vector<48x64xf32>
    %c0_6 = arith.constant 0 : index
    %c0_7 = arith.constant 0 : index
    %c0_8 = arith.constant 0 : index
    %7 = vector.load %arg5[%c0_6, %c0_7, %c0_8] : memref<1x48x64xf32, #tpu.memory_space<vmem>>, vector<1x48x64xf32>
    %8 = vector.shape_cast %7 : vector<1x48x64xf32> to vector<48x64xf32>
    %9 = vector.shape_cast %6 : vector<48x64xf32> to vector<1x48x64xf32>
    tpu.vector_store %arg5[%c0_6, %c0_7, %c0_8], %9 {strides = array<i32>} : memref<1x48x64xf32, #tpu.memory_space<vmem>>, vector<1x48x64xf32>,
    return
  }
  func.func @transform_0(%arg0: i32, %arg1: i32) -> (i32, i32, i32) {
    %c0_i32 = arith.constant 0 : i32
    %c0_i32_0 = arith.constant 0 : i32
    return %arg0, %c0_i32, %arg1 : i32, i32, i32
  }
  func.func @transform_1(%arg0: i32, %arg1: i32) -> (i32, i32) {
    %c0_i32 = arith.constant 0 : i32
    %c0_i32_0 = arith.constant 0 : i32
    %c0_i32_1 = arith.constant 0 : i32
    return %c0_i32, %c0_i32_0 : i32, i32
  }
  func.func @transform_2(%arg0: i32, %arg1: i32) -> (i32, i32) {
    %c0_i32 = arith.constant 0 : i32
    %c0_i32_0 = arith.constant 0 : i32
    %c0_i32_1 = arith.constant 0 : i32
    return %c0_i32, %c0_i32_0 : i32, i32
  }
  func.func @transform_3(%arg0: i32, %arg1: i32) -> (i32, i32, i32) {
    %c0_i32 = arith.constant 0 : i32
    %c0_i32_0 = arith.constant 0 : i32
    return %arg0, %c0_i32, %arg1 : i32, i32, i32
  }
}

</mosaic_0001>

<bundles_post_ra>
// kernel: tile.8
= control target key start
LH: loop header
LB: loop body
LE: loop exit
PB: predicated region body
PF: predicated region fallthrough
CT: control target
= control target key end

     0   :  { %s22_s0 = inlined_call_operand.vmem [shape: f32[12], index: 0, kind: input, shape index: {}]   ;;  %s23_s1 = inlined_call_operand.vmem [shape: f32[4,12], index: 1, kind: output, shape index: {}]  }
   0x1   :  { %v4_v0 = vld [vmem:[%s22_s0] ss:$0 sm:$0xff] }
   0x2   :  { %5 = vst [vmem:[%s23_s1] sm:$0xf] %v4_v0 }

// kernel: tile.0
= control target key start
LH: loop header
LB: loop body
LE: loop exit
PB: predicated region body
PF: predicated region fallthrough
CT: control target
= control target key end

     0   :  { %s131_s8 = smov 127   ;;  %s132_s9 = smov 123   ;;  %vm7_vm0 = vcmask 7168   ;;  %s246_s0 = inlined_call_operand.vmem [shape: f32[4,12], index: 0, kind: input, shape index: {}]   ;;  %s247_s1 = inlined_call_operand.vmem [shape: f32[48,1], index: 1, kind: output, shape index: {}]  }
   0x1   :  { %v4_v0 = vld [vmem:[%s246_s0] sm:$0xf]  ;;  %s130_s0 = smov 125   ;;  %s133_s10 = smov 124  }
   0x2   :  { %5 = vst [vmem:[#allocation0] sm:$0xf] %v4_v0  ;;  %s134_s11 = smov 126   ;;  %s135_s12 = smov 122  }
   0x3   :  { %s136_s13 = smov 120   ;;  %s137_s14 = smov 121  }
   0x4   :  { %s138_s15 = smov 119   ;;  %s139_s16 = smov 117  }
   0x5   :  { %s140_s17 = smov 118  }
   0x9   :  { %v25_v1 = vld.sshfl [vmem:[#allocation0] sm:$0xff pattern:$0x22222130]  }
   0xa   :  { %26 = vrot.lane.b32.xlu1 %v25_v1, %s130_s0  ;;  %10 = vrot.lane.b32.xlu0 %v25_v1, %s131_s8  ;;  %v65_v2 = vld.sshfl [vmem:[#allocation0] sm:$0xff pattern:$0x11111302]  }
   0xb   :  { %42 = vrot.lane.b32.xlu2 %v25_v1, %s132_s9  ;;  %v6_v6 = vld [vmem:[#allocation0] sm:$0xf]  }
   0xc   :  { %8 = vst.msk [vmem:[%s247_s1] ss:$12 sm:$0xf] %vm7_vm0, %v6_v6  }
  0x12   :  { %34 = vrot.lane.b32.xlu1 %v25_v1, %s133_s10  ;;  %18 = vrot.lane.b32.xlu0 %v25_v1, %s134_s11 }
  0x13   :  { %50 = vrot.lane.b32.xlu2 %v25_v1, %s135_s12 }
  0x1a   :  { %66 = vrot.lane.b32.xlu1 %v65_v2, %s136_s13  ;;  %58 = vrot.lane.b32.xlu0 %v25_v1, %s137_s14 }
  0x1b   :  { %74 = vrot.lane.b32.xlu2 %v65_v2, %s138_s15 }
  0x22   :  { %90 = vrot.lane.b32.xlu1 %v65_v2, %s139_s16  ;;  %82 = vrot.lane.b32.xlu0 %v65_v2, %s140_s17 }
  0x65   :  { %v43_v3 = vpop.permute.xlu2 %42  }
  0x66   :  { %105 = vst.msk [vmem:[%s247_s1 + $0x5] ss:$36 sm:$0x3] %vm7_vm0, %v43_v3  }
  0x67   :  { %106 = vst.msk [vmem:[%s247_s1 - $0x7] ss:$12 sm:$0xc] %vm7_vm0, %v43_v3  }
  0x6d   :  { %v51_v4 = vpop.permute.xlu2 %50  }
  0x6e   :  { %107 = vst.msk [vmem:[%s247_s1 + $0x6] ss:$36 sm:$0x3] %vm7_vm0, %v51_v4  }
  0x6f   :  { %108 = vst.msk [vmem:[%s247_s1 - $0x6] ss:$12 sm:$0xc] %vm7_vm0, %v51_v4  }
  0x75   :  { %v75_v5 = vpop.permute.xlu2 %74  }
  0x76   :  { %113 = vst.msk [vmem:[%s247_s1 + $0x21] ss:$-24 sm:$0x3] %vm7_vm0, %v75_v5  }
  0x77   :  { %114 = vst.msk [vmem:[%s247_s1 + $0x5d] ss:$-24 sm:$0xc] %vm7_vm0, %v75_v5  }
  0x7c   :  { %v27_v7 = vpop.permute.xlu1 %26   ;;  %v11_v8 = vpop.permute.xlu0 %10  }
  0x7d   :  { %101 = vst.msk [vmem:[%s247_s1 + $0x3] ss:$36 sm:$0x3] %vm7_vm0, %v27_v7  }
  0x7e   :  { %102 = vst.msk [vmem:[%s247_s1 - $0x9] ss:$12 sm:$0xc] %vm7_vm0, %v27_v7  }
  0x7f   :  { %97 = vst.msk [vmem:[%s247_s1 + $0x1] ss:$36 sm:$0x3] %vm7_vm0, %v11_v8  }
  0x80   :  { %98 = vst.msk [vmem:[%s247_s1 - $0xb] ss:$12 sm:$0xc] %vm7_vm0, %v11_v8  }
  0x84   :  { %v35_v9 = vpop.permute.xlu1 %34   ;;  %v19_v10 = vpop.permute.xlu0 %18  }
  0x85   :  { %103 = vst.msk [vmem:[%s247_s1 + $0x4] ss:$36 sm:$0x3] %vm7_vm0, %v35_v9  }
  0x86   :  { %104 = vst.msk [vmem:[%s247_s1 - $0x8] ss:$12 sm:$0xc] %vm7_vm0, %v35_v9  }
  0x87   :  { %99 = vst.msk [vmem:[%s247_s1 + $0x2] ss:$36 sm:$0x3] %vm7_vm0, %v19_v10  }
  0x88   :  { %100 = vst.msk [vmem:[%s247_s1 - $0xa] ss:$12 sm:$0xc] %vm7_vm0, %v19_v10  }
  0x8c   :  { %v67_v11 = vpop.permute.xlu1 %66   ;;  %v59_v12 = vpop.permute.xlu0 %58  }
  0x8d   :  { %111 = vst.msk [vmem:[%s247_s1 + $0x20] ss:$-24 sm:$0x3] %vm7_vm0, %v67_v11  }
  0x8e   :  { %112 = vst.msk [vmem:[%s247_s1 + $0x5c] ss:$-24 sm:$0xc] %vm7_vm0, %v67_v11  }
  0x8f   :  { %109 = vst.msk [vmem:[%s247_s1 + $0x7] ss:$36 sm:$0x3] %vm7_vm0, %v59_v12  }
  0x90   :  { %110 = vst.msk [vmem:[%s247_s1 - $0x5] ss:$12 sm:$0xc] %vm7_vm0, %v59_v12  }
  0x94   :  { %v91_v13 = vpop.permute.xlu1 %90   ;;  %v83_v14 = vpop.permute.xlu0 %82  }
  0x95   :  { %117 = vst.msk [vmem:[%s247_s1 + $0x23] ss:$-24 sm:$0x3] %vm7_vm0, %v91_v13  }
  0x96   :  { %118 = vst.msk [vmem:[%s247_s1 + $0x5f] ss:$-24 sm:$0xc] %vm7_vm0, %v91_v13  }
  0x97   :  { %115 = vst.msk [vmem:[%s247_s1 + $0x22] ss:$-24 sm:$0x3] %vm7_vm0, %v83_v14  }
  0x98   :  { %116 = vst.msk [vmem:[%s247_s1 + $0x5e] ss:$-24 sm:$0xc] %vm7_vm0, %v83_v14  }

// kernel: transition_up.1
= control target key start
LH: loop header
LB: loop body
LE: loop exit
PB: predicated region body
PF: predicated region fallthrough
CT: control target
= control target key end

     0   :  { %s501_s12 = smov 0   ;;  %s503_s13 = smov 0   ;;  %s589_s0 = inlined_call_operand.vmem [shape: f32[2,48,64], index: 0, kind: input, shape index: {}]   ;;  %s590_s1 = inlined_call_operand.vmem [shape: f32[48,48], index: 1, kind: input, shape index: {}]   ;;  %s591_s2 = inlined_call_operand.vmem [shape: f32[48,1], index: 2, kind: input, shape index: {}]   ;;  %s592_s3 = inlined_call_operand.vmem [shape: f32[2,48,64], index: 3, kind: output, shape index: {}]  }
   0x1   :  { %s505_s14 = smov 0  }
   0x2 LB: > { %s25_s15 = sadd.s32 1, %s474_s13  ;;  %p398_p0 = scmp.ge.s32.totalorder %s478_s14, 1  ;;  %s478_s14 = sphi %s505_s14, %s13_s14   ;;  %s474_s13 = sphi %s503_s13, %s594_s13   ;;  %s470_s12 = sphi %s501_s12, %s593_s12  }
   0x3   : > { %p27_p1 = scmp.ge.s32.totalorder %s25_s15, 2  ;;  %p156_p2 = scmp.lt.s32.totalorder %s478_s14, 3 }
   0x5   : > { %s596_s15 = smov (%p27_p1, %s25_s15), 0  ;;  %p157_p3 = pnand %p398_p0, %p156_p2 }
   0x6   : > { %p186_p4 = scmp.lt.s32.totalorder (!%p157_p3), %s470_s12, 1 }
   0x7   : > { %160 = sbr.rel (%p157_p3) target bundleno = 172 (0xac), region = 32 }
   0xc   : > { %v480_v0 = vmov 0   ;;  %s598_s12 = smov (!%p186_p4, %s470_s12), 1  ;;  %v216_v1 = vld [vmem:[%s591_s2 + $0x10] sm:$0xff]  ;;  %v214_v2 = vld [vmem:[%s591_s2] sm:$0xff]  ;;  %v203_v10 = vld [vmem:[%s590_s1 + $0x8] sm:$0xff]  ;;  %vm250_vm0 = vcmask 392192  }
   0xd   : > { %454 = vset.pattern.permute.xlu1 %v480_v0  ;;  %453 = vset.pattern.permute.xlu0 %v480_v0  ;;  %v218_v3 = vld [vmem:[%s591_s2 + $0x20] sm:$0xff]  ;;  %s427_s22 = smul.u32 48, %s598_s12  ;;  %v205_v11 = vld [vmem:[%s590_s1 + $0x18] sm:$0xff]  ;;  %v215_v15 = vld [vmem:[%s591_s2 + $0x8] sm:$0xff]  ;;  %vm304_vm1 = vcmask 523264  }
   0xe   : > { %455 = vset.pattern.permute.xlu2 %v480_v0  ;;  %232 = vperm.xlu1 %454, %v216_v1   ;;  %v206_v12 = vld [vmem:[%s590_s1 + $0x20] sm:$0xff]  ;;  %v217_v13 = vld [vmem:[%s591_s2 + $0x18] sm:$0xff]  ;;  %v219_v16 = vld [vmem:[%s591_s2 + $0x28] sm:$0xff] }
   0xf   : > { %222 = vperm.xlu0 %453, %v214_v2   ;;  %242 = vperm.xlu2 %455, %v218_v3   ;;  %s193_s25 = scalar_lea.vmem %s589_s0, %s427_s22  ;;  %v202_v14 = vld [vmem:[%s590_s1] sm:$0xff]  ;;  %v204_v17 = vld [vmem:[%s590_s1 + $0x10] sm:$0xff]  ;;  %v207_v18 = vld [vmem:[%s590_s1 + $0x28] sm:$0xff]  ;;  %s201_s24 = scalar_lea.vmem %s592_s3, %s427_s22 }
  0x10   : > { %v213_v4 = vld [vmem:[%s193_s25 + $0x28] sm:$0xff]  ;;  %v212_v5 = vld [vmem:[%s193_s25 + $0x20] sm:$0xff]  ;;  %v211_v6 = vld [vmem:[%s193_s25 + $0x18] sm:$0xff] }
  0x11   : > { %409 = vmatpush.msra.mxu1 %v213_v4  ;;  %410 = vmatpush.msra.mxu2 %v213_v4  ;;  %v210_v7 = vld [vmem:[%s193_s25 + $0x10] sm:$0xff]  ;;  %v209_v8 = vld [vmem:[%s193_s25 + $0x8] sm:$0xff]  ;;  %v208_v9 = vld [vmem:[%s193_s25] sm:$0xff] }
  0x12   : > { %411 = vmatpush.msra.mxu3 %v213_v4  ;;  %279 = vmatpush.msra.mxu0 %v213_v4 }
  0x13   : > { %412 = vmatpush.msra.mxu1 %v212_v5  ;;  %413 = vmatpush.msra.mxu2 %v212_v5 }
  0x14   : > { %414 = vmatpush.msra.mxu3 %v212_v5  ;;  %280 = vmatpush.msra.mxu0 %v212_v5 }
  0x15   : > { %415 = vmatpush.msra.mxu1 %v211_v6  ;;  %416 = vmatpush.msra.mxu2 %v211_v6 }
  0x16   : > { %417 = vmatpush.msra.mxu3 %v211_v6  ;;  %281 = vmatpush.msra.mxu0 %v211_v6 }
  0x17   : > { %418 = vmatpush.msra.mxu1 %v210_v7  ;;  %419 = vmatpush.msra.mxu2 %v210_v7 }
  0x18   : > { %420 = vmatpush.msra.mxu3 %v210_v7  ;;  %282 = vmatpush.msra.mxu0 %v210_v7 }
  0x19   : > { %421 = vmatpush.msra.mxu1 %v209_v8  ;;  %422 = vmatpush.msra.mxu2 %v209_v8 }
  0x1a   : > { %423 = vmatpush.msra.mxu3 %v209_v8  ;;  %283 = vmatpush.msra.mxu0 %v209_v8 }
  0x1b   : > { %424 = vmatpush.msra.mxu1 %v208_v9  ;;  %425 = vmatpush.msra.mxu2 %v208_v9 }
  0x1c   : > { %426 = vmatpush.msra.mxu3 %v208_v9  ;;  %402 = vmatmul.msk.f32.vlgmr.msra.gmra.mxu1 %vm250_vm0, %v203_v10 }
  0x1d   : > { %404 = vmatmul.msk.f32.vlgmr.msra.gmra.mxu2 %vm250_vm0, %v205_v11  ;;  %405 = vmatmul.msk.f32.vlgmr.msra.gmra.mxu3 %vm250_vm0, %v206_v12 }
  0x1e   : > { %284 = vmatpush.msra.mxu0 %v208_v9  ;;  %237 = vperm.xlu1 %454, %v217_v13  }
  0x1f   : > { %401 = vmatmul.msk.f32.vlgmr.msra.gmra.mxu0 %vm250_vm0, %v202_v14  ;;  %227 = vperm.xlu0 %453, %v215_v15  }
  0x20   : > { %247 = vperm.xlu2 %455, %v219_v16  }
  0x24   : > { %403 = vmatmul.msk.f32.gmra.mxu1 %vm250_vm0, %v204_v17 }
  0x25   : > { %406 = vmatmul.msk.f32.gmra.mxu3 %vm250_vm0, %v207_v18 }
  0x69   : > { %v243_v26 = vpop.permute.xlu2 %242 }
  0x7a   : > { %v248_v34 = vpop.permute.xlu2 %247 }
  0x80   : > { %v233_v20 = vpop.permute.xlu1 %232 }
  0x81   : > { %v223_v19 = vpop.permute.xlu0 %222 }
  0x90   : > { %v238_v27 = vpop.permute.xlu1 %237 }
  0x91   : > { %v228_v21 = vpop.permute.xlu0 %227 }
  0x99   : > { %v289_v22 = vpop.f32.mrf.mxu1 }
  0x9a   : > { %v290_v23 = vadd.f32 %v289_v22, %v228_v21 }
  0x9c   : > { %306 = vst.msk [vmem:[%s201_s24 + $0x8] sm:$0xff] %vm304_vm1, %v290_v23  ;;  %v286_v24 = vpop.f32.mrf.mxu0 }
  0x9d   : > { %v287_v25 = vadd.f32 %v286_v24, %v223_v19 }
  0x9f   : > { %305 = vst.msk [vmem:[%s201_s24] sm:$0xff] %vm304_vm1, %v287_v25 }
  0xa0   : > { %v295_v28 = vpop.f32.mrf.mxu2  ;;  %v298_v29 = vpop.f32.mrf.mxu3 }
  0xa1   : > { %v296_v30 = vadd.f32 %v295_v28, %v238_v27  ;;  %v299_v31 = vadd.f32 %v298_v29, %v243_v26  ;;  %v292_v32 = vpop.f32.mrf.mxu1 }
  0xa2   : > { %v293_v33 = vadd.f32 %v292_v32, %v233_v20 }
  0xa3   : > { %308 = vst.msk [vmem:[%s201_s24 + $0x18] sm:$0xff] %vm304_vm1, %v296_v30 }
  0xa4   : > { %309 = vst.msk [vmem:[%s201_s24 + $0x20] sm:$0xff] %vm304_vm1, %v299_v31 }
  0xa5   : > { %307 = vst.msk [vmem:[%s201_s24 + $0x10] sm:$0xff] %vm304_vm1, %v293_v33 }
  0xa8   : > { %v301_v35 = vpop.f32.mrf.mxu3 }
  0xa9   : > { %v302_v36 = vadd.f32 %v301_v35, %v248_v34 }
  0xab   : > { %310 = vst.msk [vmem:[%s201_s24 + $0x28] sm:$0xff] %vm304_vm1, %v302_v36 }
  0xac PF: > { %s13_s14 = sadd.s32 1, %s478_s14   ;;  %s593_s12 = smov %s474_s13 }
  0xad   : > { %p10_p5 = scmp.ge.s32.totalorder %s13_s14, 4   ;;  %s594_s13 = smov %s596_s15 }
  0xaf   :  { %12 = sbr.rel (!%p10_p5) target bundleno = 2 (0x2), region = 62 }

</bundles_post_ra>
